<compile_context>
chip_gen: v6e
topology: v6e:2x2x1
jax: 0.10.0
libtpu: 0.0.40
codegen_flags: <defaults>
</compile_context>

<pallas_src>
import jax
import jax.numpy as jnp
from jax.experimental import pallas as pl
from jax.experimental.pallas import tpu as pltpu

_LANES = 128
_SUB = 8                               # sublanes per f32 vreg
_VMEM_BUDGET = 20 * 1024 * 1024        # target working set per grid step
_VMEM_LIMIT = 48 * 1024 * 1024         # scoped-VMEM limit passed to Mosaic
_TEMP_ROWS = 10                        # est. live (T,128) f32 temporaries
_MAX_TILE_SUB = 2048                   # 256 Ki pixels per tile


def _center_crop(t, h, w):
    """crop() from the reference: center-crop (N, Ht, Wt) down to (N, h, w)."""
    th, tw = t.shape[-2], t.shape[-1]
    oh, ow = (th - h) // 2, (tw - w) // 2
    if oh > 0 and ow > 0:
        t = t[..., oh:th - oh, ow:tw - ow]
    return t


def _make_focal_kernel(*, gamma, power, num_classes, hw, tile_sub,
                       has_weight, apply_mask):
    """Builds the kernel body (statically specialized on gamma/power/weight)."""

    def kernel(*refs):
        if has_weight:
            logits_ref, target_ref, weight_ref, out_ref = refs
        else:
            logits_ref, target_ref, out_ref = refs
            weight_ref = None

        # Per-block cast (inputs stay in their native dtype in HBM).
        tgt = jnp.clip(target_ref[0].astype(jnp.int32), 0, num_classes - 1)

        # Pass 1 over classes: running per-pixel max.  Only (T, 128) values
        # stay live -- no full-C f32 temporary is ever materialized.
        m = logits_ref[0, 0].astype(jnp.float32)                 # (T, 128)
        for ci in range(1, num_classes):
            m = jnp.maximum(m, logits_ref[0, ci].astype(jnp.float32))

        # Pass 2: softmax denominator + target-class logit / exponential,
        # gathered with per-class where-selects (mask-first, per-pixel state).
        s = None
        x_t = None
        e_t = None
        for ci in range(num_classes):
            xi = logits_ref[0, ci].astype(jnp.float32)
            ei = jnp.exp(xi - m)                                 # only full-C EUP op
            sel = tgt == ci
            if ci == 0:
                s = ei
                x_t = jnp.where(sel, xi, 0.0)
                e_t = jnp.where(sel, ei, 0.0)
            else:
                s = s + ei
                x_t = jnp.where(sel, xi, x_t)
                e_t = jnp.where(sel, ei, e_t)

        log_p_t = (x_t - m) - jnp.log(s)         # log_softmax @ target class
        # p_t from the already-computed class exponential: drops the second
        # per-pixel exp (exact divide keeps parity with the f32 reference).
        p_t = e_t / s
        one_m = jnp.maximum(1.0 - p_t, 0.0)      # clamp: safe for float gamma
        contrib = log_p_t * one_m ** gamma       # integer_pow -> VPU muls

        if weight_ref is not None:
            wgt = weight_ref[0].astype(jnp.float32)              # (T, 128)
            if power != 1:
                wgt = wgt ** power
            contrib = contrib * wgt

        if apply_mask:
            # Zero out lane-padded pixels / garbage sublanes of the partial
            # last spatial tile.  Static 2-D iotas + one scalar limit, so the
            # per-pixel cost is a single compare+select (all-true except on
            # the last tile).
            sub_ids = jax.lax.broadcasted_iota(jnp.int32, (tile_sub, _LANES), 0)
            lane_ids = jax.lax.broadcasted_iota(jnp.int32, (tile_sub, _LANES), 1)
            pix_local = sub_ids * _LANES + lane_ids
            limit = hw - pl.program_id(1) * (tile_sub * _LANES)
            contrib = jnp.where(pix_local < limit, contrib, 0.0)

        # Lane/sublane-dense per-program partial: fold T down to 8 sublanes
        # with a leading-axis (VPU) sum; the scalar reduce happens in JAX.
        out_ref[0] = contrib.reshape(tile_sub // _SUB, _SUB, _LANES).sum(axis=0)

    return kernel


def weighted_focal_loss_2d(logits, target, weight=None, gamma=2, power=1,
                           tile_sublanes=None):
    """Forward of WeightedFocalLoss2d.

    logits: (N, C, H, W) float; target: (N, Ht, Wt) int; weight: (N, Ht, Wt)
    float or None. Returns a scalar float32 loss.
    """
    n, c, h, w = logits.shape
    hw = h * w

    # crop(): center-crop target / weight when they are larger than (h, w).
    target = _center_crop(target, h, w)
    if weight is not None:
        weight = _center_crop(weight, h, w)

    # Spatial rows of 128 lanes, rounded up to a multiple of 8 sublanes so
    # every Pallas block is well-formed.  Pad ONLY up to that boundary (a
    # no-op for typical image sizes where H*W % 1024 == 0); never pad up to
    # the tile boundary -- the in-kernel mask handles the ragged last tile.
    s_full = pl.cdiv(hw, _SUB * _LANES) * _SUB
    hw_lanes = s_full * _LANES

    x = logits.reshape(n, c, hw)                 # free reshape (contiguous)
    tgt = target.reshape(n, hw)                  # native dtype, no wrapper cast
    wgt = weight.reshape(n, hw) if weight is not None else None
    if hw_lanes != hw:
        pad = hw_lanes - hw
        x = jnp.pad(x, ((0, 0), (0, 0), (0, pad)))
        tgt = jnp.pad(tgt, ((0, 0), (0, pad)))
        if wgt is not None:
            wgt = jnp.pad(wgt, ((0, 0), (0, pad)))
    x = x.reshape(n, c, s_full, _LANES)
    tgt = tgt.reshape(n, s_full, _LANES)
    if wgt is not None:
        wgt = wgt.reshape(n, s_full, _LANES)
    has_weight = wgt is not None

    # ---- Tile heuristic: grow the spatial tile toward the VMEM budget. ----
    itm_x = jnp.dtype(x.dtype).itemsize
    itm_t = jnp.dtype(tgt.dtype).itemsize
    itm_w = jnp.dtype(wgt.dtype).itemsize if has_weight else 0
    # Bytes per sublane-row (128 px): double-buffered input blocks plus the
    # per-pixel f32 temporaries the kernel keeps live.
    row_bytes = (2 * (c * itm_x + itm_t + itm_w) + _TEMP_ROWS * 4) * _LANES
    if tile_sublanes is None:
        tile_sublanes = max(_SUB, min(_MAX_TILE_SUB,
                                      (_VMEM_BUDGET // row_bytes) // _SUB * _SUB))
        tile_sublanes = min(tile_sublanes, s_full)
        num_tiles = pl.cdiv(s_full, tile_sublanes)
        # Keep >= 4 roughly-even programs so both v7x TensorCores get work.
        while n * num_tiles < 4 and tile_sublanes > _SUB:
            tile_sublanes = max(_SUB, (tile_sublanes // 2) // _SUB * _SUB)
            num_tiles = pl.cdiv(s_full, tile_sublanes)
    assert tile_sublanes % _SUB == 0 and tile_sublanes >= _SUB
    num_tiles = pl.cdiv(s_full, tile_sublanes)
    covered = num_tiles * tile_sublanes * _LANES
    apply_mask = covered != hw

    operands = [x, tgt]
    in_specs = [
        pl.BlockSpec((1, c, tile_sublanes, _LANES), lambda b, t: (b, 0, t, 0)),
        pl.BlockSpec((1, tile_sublanes, _LANES), lambda b, t: (b, t, 0)),
    ]
    if has_weight:
        operands.append(wgt)
        in_specs.append(
            pl.BlockSpec((1, tile_sublanes, _LANES), lambda b, t: (b, t, 0)))

    kernel = _make_focal_kernel(
        gamma=gamma, power=power, num_classes=c, hw=hw,
        tile_sub=tile_sublanes, has_weight=has_weight, apply_mask=apply_mask)

    partials = pl.pallas_call(
        kernel,
        out_shape=jax.ShapeDtypeStruct((n * num_tiles, _SUB, _LANES), jnp.float32),
        grid=(n, num_tiles),
        in_specs=in_specs,
        out_specs=pl.BlockSpec((1, _SUB, _LANES),
                               lambda b, t: (b * num_tiles + t, 0, 0)),
        compiler_params=pltpu.CompilerParams(
            dimension_semantics=("parallel", "parallel"),
            vmem_limit_bytes=_VMEM_LIMIT),
    )(*operands)

    # loss = -logpy.mean()  (mean over the N*H*W pixels of the logits grid)
    return -jnp.sum(partials) / jnp.float32(n * hw)


def _reference(logits, target, weight, gamma=2, power=1):
    """Pure-JAX reference mirroring the PyTorch forward."""
    n, c, h, w = logits.shape
    logits = logits.astype(jnp.float32)
    log_p = jax.nn.log_softmax(logits, axis=1)
    p = jax.nn.softmax(logits, axis=1)
    tgt = jnp.clip(target, 0, c - 1)
    ymask = jax.nn.one_hot(tgt, c, axis=1, dtype=jnp.float32)     # (N, C, H, W)
    if weight is not None:
        ymask = ymask * (weight.astype(jnp.float32) ** power)[:, None, :, :]
    dweight = (1.0 - p) ** gamma
    logpy = (log_p * ymask * dweight).sum(1)
    return -logpy.mean()


if __name__ == "__main__":
    # WeightedFocalLoss2d(gamma=2, power=1) has no learnable parameters.
    gamma, power = 2, 1
    n, c, h, w = 2, 4, 16, 16

    key = jax.random.PRNGKey(0)
    k_x, k_t, k_w = jax.random.split(key, 3)
    logits = jax.random.normal(k_x, (n, c, h, w), dtype=jnp.float32)
    target = jax.random.randint(k_t, (n, h, w), 0, c, dtype=jnp.int32)
    weight = jax.random.uniform(k_w, (n, h, w), dtype=jnp.float32,
                                minval=0.5, maxval=1.5)

    # Weighted path (ragged tile: H*W=256 < one 8x128 block -> in-kernel mask).
    loss = weighted_focal_loss_2d(logits, target, weight,
                                  gamma=gamma, power=power)
    loss = jax.block_until_ready(loss)
    ref = _reference(logits, target, weight, gamma=gamma, power=power)
    assert jnp.allclose(loss, ref, rtol=1e-5, atol=1e-6), (loss, ref)

    # weight=None specialization (no ones-stream is materialized / DMA'd).
    loss_nw = weighted_focal_loss_2d(logits, target, None,
                                     gamma=gamma, power=power)
    loss_nw = jax.block_until_ready(loss_nw)
    ref_nw = _reference(logits, target, None, gamma=gamma, power=power)
    assert jnp.allclose(loss_nw, ref_nw, rtol=1e-5, atol=1e-6), (loss_nw, ref_nw)

    # Larger spatial case: exercises the multi-tile grid (balanced for 2 cores),
    # the unmasked fast path (no padding, H*W % 1024 == 0), and no wrapper pads.
    h2 = w2 = 64
    k2_x, k2_t, k2_w = jax.random.split(jax.random.PRNGKey(1), 3)
    logits2 = jax.random.normal(k2_x, (n, c, h2, w2), dtype=jnp.float32)
    target2 = jax.random.randint(k2_t, (n, h2, w2), 0, c, dtype=jnp.int32)
    weight2 = jax.random.uniform(k2_w, (n, h2, w2), dtype=jnp.float32,
                                 minval=0.5, maxval=1.5)
    loss2 = jax.block_until_ready(
        weighted_focal_loss_2d(logits2, target2, weight2,
                               gamma=gamma, power=power))
    ref2 = _reference(logits2, target2, weight2, gamma=gamma, power=power)
    assert jnp.allclose(loss2, ref2, rtol=1e-5, atol=1e-6), (loss2, ref2)

    print("KERNEL_OK")
</pallas_src>

<mosaic_0001>
module attributes {stable_mosaic.version = 11 : i64} {
  func.func @kernel(%arg0: i32, %arg1: i32, %arg2: memref<1x4x8x128xf32, #tpu.memory_space<vmem>>, %arg3: memref<1x8x128xi32, #tpu.memory_space<vmem>>, %arg4: memref<1x8x128xf32, #tpu.memory_space<vmem>>, %arg5: memref<1x8x128xf32, #tpu.memory_space<vmem>>) attributes {dimension_semantics = [#tpu.dimension_semantics<parallel>, #tpu.dimension_semantics<parallel>], iteration_bounds = array<i64: 2, 1>, scalar_prefetch = 0 : i64, scratch_operands = 0 : i64, tpu.core_type = #tpu.core_type<tc>, window_params = [{transform_indices = @transform_0, window_bounds = array<i64: 1, 4, 8, 128>}, {transform_indices = @transform_1, window_bounds = array<i64: 1, 8, 128>}, {transform_indices = @transform_2, window_bounds = array<i64: 1, 8, 128>}, {transform_indices = @transform_3, window_bounds = array<i64: 1, 8, 128>}]} {
    %c0 = arith.constant 0 : index
    %c0_0 = arith.constant 0 : index
    %c0_1 = arith.constant 0 : index
    %0 = vector.load %arg3[%c0, %c0_0, %c0_1] : memref<1x8x128xi32, #tpu.memory_space<vmem>>, vector<1x8x128xi32>
    %1 = vector.shape_cast %0 : vector<1x8x128xi32> to vector<8x128xi32>
    %c0_i32 = arith.constant 0 : i32
    %c3_i32 = arith.constant 3 : i32
    %2 = vector.broadcast %c0_i32 : i32 to vector<8x128xi32>
    %3 = arith.maxsi %2, %1 : vector<8x128xi32>
    %4 = vector.broadcast %c3_i32 : i32 to vector<8x128xi32>
    %5 = arith.minsi %4, %3 : vector<8x128xi32>
    %c0_2 = arith.constant 0 : index
    %c0_3 = arith.constant 0 : index
    %c0_4 = arith.constant 0 : index
    %c0_5 = arith.constant 0 : index
    %6 = vector.load %arg2[%c0_2, %c0_3, %c0_4, %c0_5] : memref<1x4x8x128xf32, #tpu.memory_space<vmem>>, vector<1x1x8x128xf32>
    %7 = vector.shape_cast %6 : vector<1x1x8x128xf32> to vector<8x128xf32>
    %c0_6 = arith.constant 0 : index
    %c1 = arith.constant 1 : index
    %c0_7 = arith.constant 0 : index
    %c0_8 = arith.constant 0 : index
    %8 = vector.load %arg2[%c0_6, %c1, %c0_7, %c0_8] : memref<1x4x8x128xf32, #tpu.memory_space<vmem>>, vector<1x1x8x128xf32>
    %9 = vector.shape_cast %8 : vector<1x1x8x128xf32> to vector<8x128xf32>
    %10 = arith.maximumf %7, %9 : vector<8x128xf32>
    %c0_9 = arith.constant 0 : index
    %c2 = arith.constant 2 : index
    %c0_10 = arith.constant 0 : index
    %c0_11 = arith.constant 0 : index
    %11 = vector.load %arg2[%c0_9, %c2, %c0_10, %c0_11] : memref<1x4x8x128xf32, #tpu.memory_space<vmem>>, vector<1x1x8x128xf32>
    %12 = vector.shape_cast %11 : vector<1x1x8x128xf32> to vector<8x128xf32>
    %13 = arith.maximumf %10, %12 : vector<8x128xf32>
    %c0_12 = arith.constant 0 : index
    %c3 = arith.constant 3 : index
    %c0_13 = arith.constant 0 : index
    %c0_14 = arith.constant 0 : index
    %14 = vector.load %arg2[%c0_12, %c3, %c0_13, %c0_14] : memref<1x4x8x128xf32, #tpu.memory_space<vmem>>, vector<1x1x8x128xf32>
    %15 = vector.shape_cast %14 : vector<1x1x8x128xf32> to vector<8x128xf32>
    %16 = arith.maximumf %13, %15 : vector<8x128xf32>
    %c0_15 = arith.constant 0 : index
    %c0_16 = arith.constant 0 : index
    %c0_17 = arith.constant 0 : index
    %c0_18 = arith.constant 0 : index
    %17 = vector.load %arg2[%c0_15, %c0_16, %c0_17, %c0_18] : memref<1x4x8x128xf32, #tpu.memory_space<vmem>>, vector<1x1x8x128xf32>
    %18 = vector.shape_cast %17 : vector<1x1x8x128xf32> to vector<8x128xf32>
    %19 = arith.subf %18, %16 : vector<8x128xf32>
    %20 = math.exp %19 : vector<8x128xf32>
    %c0_i32_19 = arith.constant 0 : i32
    %21 = vector.broadcast %c0_i32_19 : i32 to vector<8x128xi32>
    %22 = arith.cmpi eq, %5, %21 : vector<8x128xi32>
    %cst = arith.constant 0.000000e+00 : f32
    %23 = vector.broadcast %cst : f32 to vector<8x128xf32>
    %24 = arith.select %22, %18, %23 : vector<8x128xi1>, vector<8x128xf32>
    %cst_20 = arith.constant 0.000000e+00 : f32
    %25 = vector.broadcast %cst_20 : f32 to vector<8x128xf32>
    %26 = arith.select %22, %20, %25 : vector<8x128xi1>, vector<8x128xf32>
    %c0_21 = arith.constant 0 : index
    %c1_22 = arith.constant 1 : index
    %c0_23 = arith.constant 0 : index
    %c0_24 = arith.constant 0 : index
    %27 = vector.load %arg2[%c0_21, %c1_22, %c0_23, %c0_24] : memref<1x4x8x128xf32, #tpu.memory_space<vmem>>, vector<1x1x8x128xf32>
    %28 = vector.shape_cast %27 : vector<1x1x8x128xf32> to vector<8x128xf32>
    %29 = arith.subf %28, %16 : vector<8x128xf32>
    %30 = math.exp %29 : vector<8x128xf32>
    %c1_i32 = arith.constant 1 : i32
    %31 = vector.broadcast %c1_i32 : i32 to vector<8x128xi32>
    %32 = arith.cmpi eq, %5, %31 : vector<8x128xi32>
    %33 = arith.addf %20, %30 : vector<8x128xf32>
    %34 = arith.select %32, %28, %24 : vector<8x128xi1>, vector<8x128xf32>
    %35 = arith.select %32, %30, %26 : vector<8x128xi1>, vector<8x128xf32>
    %c0_25 = arith.constant 0 : index
    %c2_26 = arith.constant 2 : index
    %c0_27 = arith.constant 0 : index
    %c0_28 = arith.constant 0 : index
    %36 = vector.load %arg2[%c0_25, %c2_26, %c0_27, %c0_28] : memref<1x4x8x128xf32, #tpu.memory_space<vmem>>, vector<1x1x8x128xf32>
    %37 = vector.shape_cast %36 : vector<1x1x8x128xf32> to vector<8x128xf32>
    %38 = arith.subf %37, %16 : vector<8x128xf32>
    %39 = math.exp %38 : vector<8x128xf32>
    %c2_i32 = arith.constant 2 : i32
    %40 = vector.broadcast %c2_i32 : i32 to vector<8x128xi32>
    %41 = arith.cmpi eq, %5, %40 : vector<8x128xi32>
    %42 = arith.addf %33, %39 : vector<8x128xf32>
    %43 = arith.select %41, %37, %34 : vector<8x128xi1>, vector<8x128xf32>
    %44 = arith.select %41, %39, %35 : vector<8x128xi1>, vector<8x128xf32>
    %c0_29 = arith.constant 0 : index
    %c3_30 = arith.constant 3 : index
    %c0_31 = arith.constant 0 : index
    %c0_32 = arith.constant 0 : index
    %45 = vector.load %arg2[%c0_29, %c3_30, %c0_31, %c0_32] : memref<1x4x8x128xf32, #tpu.memory_space<vmem>>, vector<1x1x8x128xf32>
    %46 = vector.shape_cast %45 : vector<1x1x8x128xf32> to vector<8x128xf32>
    %47 = arith.subf %46, %16 : vector<8x128xf32>
    %48 = math.exp %47 : vector<8x128xf32>
    %c3_i32_33 = arith.constant 3 : i32
    %49 = vector.broadcast %c3_i32_33 : i32 to vector<8x128xi32>
    %50 = arith.cmpi eq, %5, %49 : vector<8x128xi32>
    %51 = arith.addf %42, %48 : vector<8x128xf32>
    %52 = arith.select %50, %46, %43 : vector<8x128xi1>, vector<8x128xf32>
    %53 = arith.select %50, %48, %44 : vector<8x128xi1>, vector<8x128xf32>
    %54 = arith.subf %52, %16 : vector<8x128xf32>
    %55 = math.log %51 : vector<8x128xf32>
    %56 = arith.subf %54, %55 : vector<8x128xf32>
    %57 = arith.divf %53, %51 : vector<8x128xf32>
    %cst_34 = arith.constant 1.000000e+00 : f32
    %58 = vector.broadcast %cst_34 : f32 to vector<8x128xf32>
    %59 = arith.subf %58, %57 : vector<8x128xf32>
    %cst_35 = arith.constant 0.000000e+00 : f32
    %60 = vector.broadcast %cst_35 : f32 to vector<8x128xf32>
    %61 = arith.maximumf %59, %60 : vector<8x128xf32>
    %62 = arith.mulf %61, %61 : vector<8x128xf32>
    %63 = arith.mulf %56, %62 : vector<8x128xf32>
    %c0_36 = arith.constant 0 : index
    %c0_37 = arith.constant 0 : index
    %c0_38 = arith.constant 0 : index
    %64 = vector.load %arg4[%c0_36, %c0_37, %c0_38] : memref<1x8x128xf32, #tpu.memory_space<vmem>>, vector<1x8x128xf32>
    %65 = vector.shape_cast %64 : vector<1x8x128xf32> to vector<8x128xf32>
    %66 = arith.mulf %63, %65 : vector<8x128xf32>
    %67 = tpu.iota {dimensions = array<i32: 0>} : vector<8x128xi32>
    %68 = tpu.iota {dimensions = array<i32: 1>} : vector<8x128xi32>
    %c128_i32 = arith.constant 128 : i32
    %69 = vector.broadcast %c128_i32 : i32 to vector<8x128xi32>
    %70 = arith.muli %67, %69 : vector<8x128xi32>
    %71 = arith.addi %70, %68 : vector<8x128xi32>
    %c1024_i32 = arith.constant 1024 : i32
    %72 = arith.muli %arg1, %c1024_i32 : i32
    %c256_i32 = arith.constant 256 : i32
    %73 = arith.subi %c256_i32, %72 : i32
    %74 = vector.broadcast %73 : i32 to vector<8x128xi32>
    %75 = arith.cmpi slt, %71, %74 : vector<8x128xi32>
    %cst_39 = arith.constant 0.000000e+00 : f32
    %76 = vector.broadcast %cst_39 : f32 to vector<8x128xf32>
    %77 = arith.select %75, %66, %76 : vector<8x128xi1>, vector<8x128xf32>
    %78 = vector.shape_cast %77 : vector<8x128xf32> to vector<1x8x128xf32>
    %cst_40 = arith.constant dense<0.000000e+00> : vector<8x128xf32>
    %79 = vector.multi_reduction <add>, %78, %cst_40 [0] : vector<1x8x128xf32> to vector<8x128xf32>
    %c0_41 = arith.constant 0 : index
    %c0_42 = arith.constant 0 : index
    %c0_43 = arith.constant 0 : index
    %80 = vector.load %arg5[%c0_41, %c0_42, %c0_43] : memref<1x8x128xf32, #tpu.memory_space<vmem>>, vector<1x8x128xf32>
    %81 = vector.shape_cast %80 : vector<1x8x128xf32> to vector<8x128xf32>
    %82 = vector.shape_cast %79 : vector<8x128xf32> to vector<1x8x128xf32>
    tpu.vector_store %arg5[%c0_41, %c0_42, %c0_43], %82 {strides = array<i32>} : memref<1x8x128xf32, #tpu.memory_space<vmem>>, vector<1x8x128xf32>,
    return
  }
  func.func @transform_0(%arg0: i32, %arg1: i32) -> (i32, i32, i32, i32) {
    %c0_i32 = arith.constant 0 : i32
    %c0_i32_0 = arith.constant 0 : i32
    %c0_i32_1 = arith.constant 0 : i32
    return %arg0, %c0_i32, %arg1, %c0_i32_0 : i32, i32, i32, i32
  }
  func.func @transform_1(%arg0: i32, %arg1: i32) -> (i32, i32, i32) {
    %c0_i32 = arith.constant 0 : i32
    %c0_i32_0 = arith.constant 0 : i32
    return %arg0, %arg1, %c0_i32 : i32, i32, i32
  }
  func.func @transform_2(%arg0: i32, %arg1: i32) -> (i32, i32, i32) {
    %c0_i32 = arith.constant 0 : i32
    %c0_i32_0 = arith.constant 0 : i32
    return %arg0, %arg1, %c0_i32 : i32, i32, i32
  }
  func.func @transform_3(%arg0: i32, %arg1: i32) -> (i32, i32, i32) {
    %c1_i32 = arith.constant 1 : i32
    %0 = arith.muli %arg0, %c1_i32 : i32
    %1 = arith.addi %0, %arg1 : i32
    %c0_i32 = arith.constant 0 : i32
    %c0_i32_0 = arith.constant 0 : i32
    %c0_i32_1 = arith.constant 0 : i32
    return %1, %c0_i32, %c0_i32_0 : i32, i32, i32
  }
}

</mosaic_0001>

<bundles_post_ra>
// kernel: tpu_custom_call.1
= control target key start
LH: loop header
LB: loop body
LE: loop exit
PB: predicated region body
PF: predicated region fallthrough
CT: control target
= control target key end

     0   :  { %s992_s0 = inlined_call_operand.hbm [shape: f32[2,4,8,128], index: 0, kind: input, shape index: {}]   ;;  %s993_s1 = inlined_call_operand.hbm [shape: s32[2,8,128], index: 1, kind: input, shape index: {}]   ;;  %s994_s2 = inlined_call_operand.hbm [shape: f32[2,8,128], index: 2, kind: input, shape index: {}]   ;;  %s995_s3 = inlined_call_operand.hbm [shape: f32[2,8,128], index: 3, kind: output, shape index: {}]  }
   0x1   :  { %997 = sst [smem:[#allocation12_spill]] %s992_s0 }
   0x2   :  { %998 = sst [smem:[#allocation13_spill]] %s993_s1 }
   0x3   :  { %999 = sst [smem:[#allocation14_spill]] %s994_s2 }
   0x4   :  { %8 = vsyncpa [#allocation3], 0 }
   0x5   :  { %10 = vsyncpa [#allocation3 + $0x1], 0 }
   0x6   :  { %11 = vsyncpa [#allocation6], 0 }
   0x7   :  { %13 = vsyncpa [#allocation6 + $0x1], 0 }
   0x8   :  { %14 = vsyncpa [#allocation4], 0 }
   0x9   :  { %16 = vsyncpa [#allocation4 + $0x1], 0  ;;  %s798_s12 = smov 0   ;;  %s800_s13 = smov 0  }
   0xa   :  { %s802_s14 = smov 0   ;;  %s804_s15 = smov 0  }
   0xb   :  { %s806_s16 = smov 0   ;;  %s808_s17 = smov 0  }
   0xc LB: > { %s829_s18 = sadd.s32 4294967295, %s770_s17   ;;  %s493_s19 = sadd.s32 4294967294, %s770_s17   ;;  %s770_s17 = sphi %s808_s17, %s22_s17   ;;  %s766_s16 = sphi %s806_s16, %s1015_s16   ;;  %s762_s15 = sphi %s804_s15, %s1014_s15   ;;  %s758_s14 = sphi %s802_s14, %s1013_s14   ;;  %s754_s13 = sphi %s800_s13, %s1012_s13   ;;  %s750_s12 = sphi %s798_s12, %s1011_s12  }
   0xd   : > { %s34_s20 = sadd.s32 1, %s766_s16  ;;  %s43_s21 = sadd.s32 1, %s758_s14 }
   0xe   : > { %p36_p0 = scmp.ge.s32.totalorder %s34_s20, 2  ;;  %p50_p1 = scmp.ne.s32.totalorder %s758_s14, %s754_s13 }
   0xf   : > { %p51_p2 = scmp.eq.s32.totalorder %s770_s17, 0  ;;  %p56_p3 = scmp.ne.s32.totalorder %s754_s13, %s750_s12 }
  0x10   : > { %s1017_s20 = smov (%p36_p0, %s34_s20), 0  ;;  %p57_p5 = scmp.eq.s32.totalorder %s829_s18, 0 }
  0x11   : > { %p841_p4 = por %p51_p2, %p50_p1  ;;  %s38_s23 = ssub.s32 %s766_s16, %s1017_s20 }
  0x12   : > { %p138_p6 = scmp.eq.s32.totalorder %s829_s18, 1  ;;  %p41_p7 = scmp.eq.s32.totalorder %s38_s23, 0 }
  0x13   : > { %p849_p8 = por %p57_p5, %p56_p3  ;;  %p144_p10 = scmp.eq.s32.totalorder %s493_s19, 1 }
  0x14   : > { %p853_p9 = por %p138_p6, %p50_p1  ;;  %p538_p13 = scmp.lt.s32.totalorder %s770_s17, 2 }
  0x15   : > { %s858_s26 = scalar_select %p41_p7, %s758_s14, %s43_s21  }
  0x16   : > { %p860_p11 = por %p144_p10, %p56_p3  ;;  %s867_s28 = sand.u32 1, %s758_s14  }
  0x17   : > { %s186_s29 = sand.u32 1, %s770_s17   ;;  %s996_s30 = sshll.u32 %s867_s28, 3 }
  0x18   : > { %p873_p0 = pnand %p538_p13, %p841_p4  ;;  %s500_s5 = sshll.u32 %s766_s16, 7 }
  0x19   : > { %s1005_s1 = sld [smem:[#allocation13_spill]]  ;;  %s190_s9 = scalar_lea.vmem [#allocation5], %s996_s30 }
  0x1a   : > { %s198_s10 = sshll.u32 %s190_s9, 4  ;;  %s1006_s2 = sld [smem:[#allocation14_spill]]  ;;  %s199_s10 = int_to_ptr.vmem [resolvable:$true] %s198_s10 }
  0x1b   : > { %s888_s22 = scalar_lea.sflag [#allocation6], %s186_s29  ;;  %p604_p1 = pneg %p873_p0 }
  0x1c   : > { %s615_s23 = scalar_lea.vmem %s199_s10, 128  ;;  %s772_s6 = smov [#allocation5]  }
  0x1d   : > { %p616_p2 = scmp.ne.s32.totalorder %s199_s10, %s615_s23  ;;  %s620_s7 = sshll.u32 %s772_s6, 4  ;;  %s621_s7 = int_to_ptr.vmem [resolvable:$false] %s620_s7 }
  0x1e   : > { %s622_s9 = scalar_lea.vmem %s621_s7, 256  ;;  %p623_p5 = scmp.lt.s32.totalorder %s199_s10, %s621_s7 }
  0x1f   : > { %s196_s8 = scalar_lea.hbm %s1005_s1, %s500_s5  ;;  %p618_p3 = pnand %p616_p2, %p604_p1 }
  0x20   : > { %s886_s21 = scalar_lea.hbm %s1006_s2, %s500_s5  ;;  %p624_p6 = scmp.lt.s32.totalorder %s622_s9, %s615_s23 }
  0x21   : > { %p619_p4 = pneg %p618_p3 }
  0x22   : > { %p625_p7 = por %p624_p6, %p623_p5 }
  0x24   : > { %p626_p10 = pnand %p625_p7, %p619_p4 }
  0x26   : > { %629 = shalt.err (!%p626_p10)
}
  0x27   : > { %530 = dma.hbm_to_vmem [thread:$0]  (!%p873_p0), %s196_s8, 128, %s199_s10, %s888_s22  }
  0x28   : > { %p503_p13 = scmp.ge.s32.totalorder %s770_s17, 1  ;;  %p222_p2 = scmp.lt.s32.totalorder %s770_s17, 3 }
  0x29   : > { %s496_s5 = sshll.u32 %s867_s28, 5  ;;  %s515_s11 = sshll.u32 %s766_s16, 9 }
  0x2a   : > { %p900_p3 = pnand %p503_p13, %p222_p2  ;;  %s1008_s0 = sld [smem:[#allocation12_spill]] }
  0x2b   : > { %s168_s7 = scalar_lea.vmem [#allocation2], %s496_s5  ;;  %s165_s30 = scalar_lea.sflag [#allocation3], %s867_s28 }
  0x2c   : > { %s176_s9 = sshll.u32 %s168_s7, 4  ;;  %s773_s8 = smov [#allocation2]   ;;  %s177_s9 = int_to_ptr.vmem [resolvable:$true] %s176_s9 }
  0x2d   : > { %s643_s1 = scalar_lea.vmem %s177_s9, 512  ;;  %s648_s10 = sshll.u32 %s773_s8, 4  ;;  %s649_s10 = int_to_ptr.vmem [resolvable:$false] %s648_s10 }
  0x2e   : > { %p644_p4 = scmp.ne.s32.totalorder %s177_s9, %s643_s1  ;;  %s650_s2 = scalar_lea.vmem %s649_s10, 1024 }
  0x2f   : > { %p651_p7 = scmp.lt.s32.totalorder %s177_s9, %s649_s10  ;;  %p652_p10 = scmp.lt.s32.totalorder %s650_s2, %s643_s1 }
  0x30   : > { %s175_s6 = scalar_lea.hbm %s1008_s0, %s515_s11  ;;  %p646_p5 = pnand %p644_p4, %p604_p1 }
  0x31   : > { %p653_p13 = por %p652_p10, %p651_p7 }
  0x32   : > { %p647_p6 = pneg %p646_p5 }
  0x34   : > { %p654_p2 = pnand %p653_p13, %p647_p6 }
  0x36   : > { %657 = shalt.err (!%p654_p2)
}
  0x37   : > { %s774_s11 = smov 128   ;;  %s775_s5 = smov 8  }
  0x38   : > { %527 = dma.hbm_to_vmem [thread:$0]  (!%p873_p0), %s175_s6, 512, %s177_s9, %s165_s30, %s774_s11, %s774_s11, %s775_s5  }
  0x39   : > { %s1009_s19 = sshll.u32 %s867_s28, 3  ;;  %s776_s1 = smov [#allocation7]  }
  0x3a   : > { %s209_s23 = scalar_lea.vmem [#allocation7], %s1009_s19  ;;  %s676_s2 = sshll.u32 %s776_s1, 4  ;;  %s677_s2 = int_to_ptr.vmem [resolvable:$false] %s676_s2 }
  0x3b   : > { %s217_s7 = sshll.u32 %s209_s23, 4  ;;  %s678_s8 = scalar_lea.vmem %s677_s2, 256  ;;  %s218_s7 = int_to_ptr.vmem [resolvable:$true] %s217_s7 }
  0x3c   : > { %s671_s0 = scalar_lea.vmem %s218_s7, 128  ;;  %p679_p6 = scmp.lt.s32.totalorder %s218_s7, %s677_s2 }
  0x3d   : > { %p672_p4 = scmp.ne.s32.totalorder %s218_s7, %s671_s0  ;;  %p680_p7 = scmp.lt.s32.totalorder %s678_s8, %s671_s0 }
  0x3f   : > { %p674_p5 = pnand %p672_p4, %p604_p1  ;;  %p681_p10 = por %p680_p7, %p679_p6 }
  0x41   : > { %p675_p12 = pneg %p674_p5 }
  0x43   : > { %p682_p13 = pnand %p681_p10, %p675_p12 }
  0x45   : > { %685 = shalt.err (!%p682_p13)
}
  0x46   : > { %533 = dma.hbm_to_vmem [thread:$0]  (!%p873_p0), %s886_s21, 128, %s218_s7, %s888_s22  }
  0x47   : > { %226 = sbr.rel (%p900_p3) target bundleno = 153 (0x99), region = 32  ;;  %s927_s28 = sand.u32 (!%p900_p3), 1, %s754_s13  }
  0x48   : > { %s504_s30 = sshll.u32 (!%p900_p3), %s927_s28, 5  ;;  %s229_s6 = scalar_lea.sflag (!%p900_p3), [#allocation3], %s927_s28 }
  0x49   : > { %s232_s0 = scalar_lea.vmem (!%p900_p3), [#allocation2], %s504_s30 }
  0x4c   : > { %737 = dma.done.wait (%p849_p8), %s229_s6, 512  }
  0x4d   : > { %739 = vsyncadd (%p849_p8), %s229_s6, 4294966784  ;;  %s237_s4 = sand.u32 1, %s829_s18   ;;  %s937_s21 = sshll.u32 %s927_s28, 3 }
  0x4e   : > { %s238_s22 = scalar_lea.sflag [#allocation6], %s237_s4  ;;  %s241_s29 = scalar_lea.vmem [#allocation5], %s937_s21 }
  0x4f   : > { %741 = dma.done.wait (%p849_p8), %s238_s22, 256  }
  0x50   : > { %743 = vsyncadd (%p849_p8), %s238_s22, 4294967040  ;;  %v289_v0 = vld [vmem:[%s232_s0] sm:$0xff]  ;;  %v508_v1 = vld [vmem:[%s232_s0 + $0x8] sm:$0xff]  ;;  %v338_v29 = vlaneseq  ;;  %s250_s18 = scalar_lea.vmem [#allocation7], %s937_s21  ;;  %s282_s24 = scalar_lea.vmem [#allocation8], %s937_s21 }
  0x51   : > { %v292_v2 = vmax.f32 %v289_v0, %v508_v1  ;;  %v509_v3 = vld [vmem:[%s232_s0 + $0x10] sm:$0xff]  ;;  %v510_v4 = vld [vmem:[%s232_s0 + $0x18] sm:$0xff]  ;;  %v284_v15 = vld [vmem:[%s241_s29] sm:$0xff]  ;;  %s366_s9 = sshll.u32 %s282_s24, 4  ;;  %s512_s10 = sshll.u32 %s762_s15, 7  ;;  %s947_s9 = int_to_ptr.vmem [resolvable:$true] %s366_s9 }
  0x52   : > { %vm285_vm0 = vcmp.gt.s32.totalorder %v284_v15, 0  ;;  %v339_v34 = vshrl.u32 %v338_v29, 7  ;;  %v341_v40 = vand.u32 127, %v338_v29  ;;  %v336_v47 = vld [vmem:[%s250_s18] sm:$0xff]  ;;  %s364_s19 = scalar_lea.hbm %s995_s3, %s512_s10  ;;  %s352_s23 = scalar_lea.sflag [#allocation4], %s927_s28 }
  0x53   : > { %v295_v5 = vmax.f32 %v292_v2, %v509_v3  ;;  %v286_v16 = vsel %vm285_vm0, %v284_v15, 0  ;;  %s686_s7 = scalar_lea.vmem %s947_s9, 128  ;;  %s777_s15 = smov [#allocation8]  }
  0x54   : > { %vm287_vm1 = vcmp.lt.s32.totalorder %v286_v16, 3  ;;  %v342_v41 = vmul.u32 128, %v339_v34  ;;  %p687_p8 = scmp.ne.s32.totalorder %s947_s9, %s686_s7  ;;  %s690_s1 = sshll.u32 %s777_s15, 4  ;;  %s691_s1 = int_to_ptr.vmem [resolvable:$false] %s690_s1 }
  0x55   : > { %v298_v6 = vmax.f32 %v295_v5, %v510_v4  ;;  %v288_v23 = vsel %vm287_vm1, %v286_v16, 3  ;;  %s692_s2 = scalar_lea.vmem %s691_s1, 256  ;;  %p693_p1 = scmp.lt.s32.totalorder %s947_s9, %s691_s1 }
  0x56   : > { %vm302_vm2 = vcmp.eq.s32.totalorder %v288_v23, 0  ;;  %vm308_vm3 = vcmp.eq.s32.totalorder %v288_v23, 1  ;;  %vm315_vm4 = vcmp.eq.s32.totalorder %v288_v23, 2  ;;  %vm322_vm5 = vcmp.eq.s32.totalorder %v288_v23, 3  ;;  %p688_p12 = pnand %p687_p8, %p853_p9  ;;  %p694_p3 = scmp.lt.s32.totalorder %s692_s2, %s686_s7 }
  0x57   : > { %v299_v7 = vsub.f32 %v289_v0, %v298_v6  ;;  %v305_v8 = vsub.f32 %v508_v1, %v298_v6  ;;  %v312_v9 = vsub.f32 %v509_v3, %v298_v6  ;;  %v319_v10 = vsub.f32 %v510_v4, %v298_v6 }
  0x58   : > { %v303_v25 = vsel %vm302_vm2, %v289_v0, 0.0  ;;  %v343_v45 = vadd.s32 %v342_v41, %v341_v40  ;;  %p689_p0 = pneg %p688_p12  ;;  %p695_p2 = por %p694_p3, %p693_p1 }
  0x59   : > { %v300_v11 = vmul.f32 1.442695, %v299_v7  ;;  %v306_v12 = vmul.f32 1.442695, %v305_v8  ;;  %v313_v13 = vmul.f32 1.442695, %v312_v9  ;;  %v310_v27 = vsel %vm308_vm3, %v508_v1, %v303_v25 }
  0x5a   : > { %v320_v14 = vmul.f32 1.442695, %v319_v10  ;;  %v317_v30 = vsel %vm315_vm4, %v509_v3, %v310_v27  ;;  %vm347_vm6 = vcmp.lt.s32.totalorder %v343_v45, 256  ;;  %p696_p4 = pnand %p695_p2, %p689_p0 }
  0x5b   : > { %590 = vpow2.f32 %v300_v11  ;;  %v324_v32 = vsel %vm322_vm5, %v510_v4, %v317_v30 }
  0x5c   : > { %592 = vpow2.f32 %v306_v12  ;;  %v326_v37 = vsub.f32 %v324_v32, %v298_v6 }
  0x5d   : > { %594 = vpow2.f32 %v313_v13 }
  0x5e   : > { %596 = vpow2.f32 %v320_v14 }
  0x68   : > { %v591_v17 = vpop.eup %590 }
  0x69   : > { %v593_v18 = vpop.eup %592  ;;  %v304_v26 = vsel %vm302_vm2, %v591_v17, 0.0 }
  0x6a   : > { %v595_v19 = vpop.eup %594  ;;  %v309_v20 = vadd.f32 %v593_v18, %v591_v17  ;;  %v311_v28 = vsel %vm308_vm3, %v593_v18, %v304_v26 }
  0x6b   : > { %v597_v21 = vpop.eup %596  ;;  %v318_v31 = vsel %vm315_vm4, %v595_v19, %v311_v28 }
  0x6c   : > { %v316_v22 = vadd.f32 %v595_v19, %v309_v20  ;;  %v325_v33 = vsel %vm322_vm5, %v597_v21, %v318_v31 }
  0x6e   : > { %v323_v24 = vadd.f32 %v597_v21, %v316_v22 }
  0x70   : > { %598 = vlog2.f32 %v323_v24 }
  0x71   : > { %600 = vrcp.f32 %v323_v24 }
  0x7d   : > { %v599_v35 = vpop.eup %598 }
  0x7e   : > { %v601_v36 = vpop.eup %600  ;;  %v328_v38 = vmul.f32 0.6931472, %v599_v35 }
  0x7f   : > { %v331_v39 = vmul.f32 %v601_v36, %v325_v33 }
  0x80   : > { %v329_v43 = vsub.f32 %v326_v37, %v328_v38 }
  0x81   : > { %v332_v42 = vsub.f32 1.0, %v331_v39 }
  0x83   : > { %v333_v44 = vmax.f32 %v332_v42, 0.0 }
  0x85   : > { %v334_v46 = vmul.f32 %v333_v44, %v333_v44 }
  0x87   : > { %v335_v48 = vmul.f32 %v334_v46, %v329_v43 }
  0x89   : > { %v337_v49 = vmul.f32 %v336_v47, %v335_v48 }
  0x8b   : > { %v348_v50 = vsel %vm347_vm6, %v337_v49, 0.0 }
  0x8c   : > { %350 = vst [vmem:[%s282_s24] sm:$0xff] %v348_v50 }
  0x8d   : > { %699 = shalt.err (!%p696_p4)
}
  0x8e   : > { %s700_s8 = scalar_lea.hbm %s364_s19, 128  ;;  %s704_s6 = scalar_lea.hbm %s995_s3, 256 }
  0x8f   : > { %p701_p5 = scmp.ne.s32.totalorder %s364_s19, %s700_s8  ;;  %p705_p10 = scmp.lt.s32.totalorder %s364_s19, %s995_s3 }
  0x90   : > { %p706_p13 = scmp.lt.s32.totalorder %s704_s6, %s700_s8 }
  0x91   : > { %p702_p6 = pnand %p701_p5, %p853_p9 }
  0x92   : > { %p707_p8 = por %p706_p13, %p705_p10 }
  0x93   : > { %p703_p7 = pneg %p702_p6 }
  0x95   : > { %p708_p12 = pnand %p707_p8, %p703_p7 }
  0x97   : > { %711 = shalt.err (!%p708_p12)
}
  0x98   : > { %522 = dma.vmem_to_hbm [thread:$0]  (%p853_p9), %s947_s9, 128, %s364_s19, %s352_s23  }
  0x99 PF: > { %s378_s21 = sand.u32 1, %s750_s12   ;;  %p1010_p0 = scmp.ge.s32.totalorder %s770_s17, 2 }
  0x9a   : > { %s379_s22 = scalar_lea.sflag [#allocation4], %s378_s21 }
  0x9b   : > { %p535_p1 = pnand %p1010_p0, %p860_p11 }
  0x9d   : > { %p536_p3 = pneg %p535_p1 }
  0x9f   : > { %745 = dma.done.wait (%p536_p3), %s379_s22, 128  }
  0xa0   : > { %747 = vsyncadd (%p536_p3), %s379_s22, 4294967168  ;;  %s22_s17 = sadd.s32 1, %s770_s17   ;;  %s1011_s12 = smov %s754_s13 }
  0xa1   : > { %p19_p2 = scmp.ge.s32.totalorder %s22_s17, 4   ;;  %s1012_s13 = smov %s758_s14 }
  0xa2   : > { %s1013_s14 = smov %s858_s26  ;;  %s1014_s15 = smov %s766_s16 }
  0xa3   : > { %s1015_s16 = smov %s1017_s20  ;;  %21 = sbr.rel (!%p19_p2) target bundleno = 12 (0xc), region = 104 }
  0xa8   :  { %384 = vsyncpa [#allocation3], 1 }
  0xa9   :  { %386 = vsyncpa [#allocation3 + $0x1], 1 }
  0xaa   :  { %387 = vsyncpa [#allocation6], 1 }
  0xab   :  { %389 = vsyncpa [#allocation6 + $0x1], 1 }
  0xac   :  { %390 = vsyncpa [#allocation4], 1 }
  0xad   :  { %392 = vsyncpa [#allocation4 + $0x1], 1 }

</bundles_post_ra>
